<compile_context>
chip_gen: v7x
topology: tpu7x:2x2x1
jax: 0.10.0
libtpu: 0.0.40
codegen_flags: <defaults>
</compile_context>

<pallas_src>
import math

import jax
import jax.numpy as jnp
from jax.experimental import pallas as pl
from jax.experimental.pallas import tpu as pltpu


def _round_up(x, m):
    return ((x + m - 1) // m) * m


def _sine_encoder_kernel(x_ref, div2_ref, w0_ref, wsc_ref, b_ref, o_ref):
    # x_ref:    [tn, 1]   eigenvalues tile
    # div2_ref: [1, h]    duplicated frequencies, x100 constant folded in
    # w0_ref:   [1, h]    linear-weight row for the raw eigenvalue feature
    # wsc_ref:  [h, h]    stacked linear-weight rows: [wsin ; wcos]
    # b_ref:    [1, h]    linear bias
    # o_ref:    [tn, h]   encoded output tile
    h = o_ref.shape[-1]
    x = x_ref[...]                                   # [tn, 1] f32
    pe = x * div2_ref[...]                           # broadcast -> [tn, h]
    lane = jax.lax.broadcasted_iota(jnp.int32, pe.shape, dimension=1)
    # first h/2 lanes carry sin features, last h/2 lanes carry cos features
    sc = jnp.where(lane < (h // 2), jnp.sin(pe), jnp.cos(pe))
    out = jnp.dot(sc, wsc_ref[...], preferred_element_type=jnp.float32)
    # raw-eigenvalue term + bias as a VPU broadcast FMA (no K=1 MXU pass)
    out = out + x * w0_ref[...] + b_ref[...]
    o_ref[...] = out.astype(o_ref.dtype)


def sine_encoder(x, weight, bias, *, hidden_dim, tile_n=512):
    """SpecFormer SineEncoder forward.

    x:      [N]    eigenvalues of the graph Laplacian.
    weight: [hidden, hidden+1]   torch nn.Linear weight layout.
    bias:   [hidden]
    returns [N, hidden] float32.
    """
    N = x.shape[0]
    h = hidden_dim
    assert h % 2 == 0, "hidden_dim must be even"
    h2 = h // 2

    # pe frequencies exp(arange(0, h, 2) * (-log(10000)/h)), with the x100
    # constant folded in host-side, duplicated so the kernel works on a
    # lane-aligned [tn, h] block (first half -> sin, second half -> cos).
    div = 100.0 * jnp.exp(
        jnp.arange(0, h, 2, dtype=jnp.float32) * (-math.log(10000.0) / h)
    )
    div2 = jnp.concatenate([div, div]).reshape(1, h)

    # PyTorch Linear: y = eeig @ weight.T + bias, eeig = [x, sin(pe), cos(pe)].
    # Split weight.T ([h+1, h]) by feature rows; sin and cos rows are stacked
    # into a single [h, h] matrix so the kernel does ONE MXU matmul.
    w_t = weight.T.astype(jnp.float32)               # [h+1, h]
    w0 = w_t[0:1, :]                                 # [1, h]
    wsc = w_t[1:, :]                                 # [h, h] = [wsin ; wcos]
    b = bias.reshape(1, h).astype(jnp.float32)

    # Row tile: big blocks amortize per-step overhead, but never larger than
    # (padded) N. Keep it a multiple of 8 (sublane alignment).
    tn = min(int(tile_n), _round_up(max(N, 1), 8))
    tn = max(8, _round_up(tn, 8))
    Np = _round_up(N, tn)

    x_col = x.reshape(N, 1).astype(jnp.float32)
    if Np != N:
        x_col = jnp.pad(x_col, ((0, Np - N), (0, 0)))

    grid = (Np // tn,)
    out = pl.pallas_call(
        _sine_encoder_kernel,
        out_shape=jax.ShapeDtypeStruct((Np, h), jnp.float32),
        grid_spec=pltpu.PrefetchScalarGridSpec(
            num_scalar_prefetch=0,
            grid=grid,
            in_specs=[
                pl.BlockSpec((tn, 1), lambda i: (i, 0)),
                pl.BlockSpec((1, h), lambda i: (0, 0)),
                pl.BlockSpec((1, h), lambda i: (0, 0)),
                pl.BlockSpec((h, h), lambda i: (0, 0)),
                pl.BlockSpec((1, h), lambda i: (0, 0)),
            ],
            out_specs=pl.BlockSpec((tn, h), lambda i: (i, 0)),
        ),
        compiler_params=pltpu.CompilerParams(
            dimension_semantics=("parallel",),
            vmem_limit_bytes=64 << 20,
        ),
    )(x_col, div2, w0, wsc, b)
    return out[:N]


def _reference(x, weight, bias, hidden_dim):
    h = hidden_dim
    ee = x * 100.0
    div = jnp.exp(jnp.arange(0, h, 2, dtype=jnp.float32) * (-math.log(10000.0) / h))
    pe = ee[:, None] * div[None, :]
    eeig = jnp.concatenate([x[:, None], jnp.sin(pe), jnp.cos(pe)], axis=1)
    return eeig @ weight.T + bias


if __name__ == "__main__":
    hidden_dim = 32
    N = 16  # number of eigenvalues (nodes)

    key = jax.random.PRNGKey(0)
    kx, kw, kb = jax.random.split(key, 3)

    # Eigenvalues of a normalized graph Laplacian lie in [0, 2].
    x = jax.random.uniform(kx, (N,), dtype=jnp.float32, minval=0.0, maxval=2.0)

    # Deterministic init of nn.Linear(hidden_dim + 1, hidden_dim) parameters
    # (uniform in +/- 1/sqrt(fan_in), like PyTorch's default).
    fan_in = hidden_dim + 1
    bound = 1.0 / math.sqrt(fan_in)
    weight = jax.random.uniform(
        kw, (hidden_dim, hidden_dim + 1), dtype=jnp.float32, minval=-bound, maxval=bound
    )
    bias = jax.random.uniform(
        kb, (hidden_dim,), dtype=jnp.float32, minval=-bound, maxval=bound
    )

    out = sine_encoder(x, weight, bias, hidden_dim=hidden_dim)
    out = jax.block_until_ready(out)

    ref = _reference(x, weight, bias, hidden_dim)
    assert out.shape == (N, hidden_dim)
    assert jnp.allclose(out, ref, atol=1e-4, rtol=1e-4)

    # Also exercise a ragged / multi-step grid path (padding + large tile).
    N2 = 1000
    x2 = jax.random.uniform(kx, (N2,), dtype=jnp.float32, minval=0.0, maxval=2.0)
    out2 = jax.block_until_ready(
        sine_encoder(x2, weight, bias, hidden_dim=hidden_dim, tile_n=512)
    )
    ref2 = _reference(x2, weight, bias, hidden_dim)
    assert out2.shape == (N2, hidden_dim)
    assert jnp.allclose(out2, ref2, atol=1e-4, rtol=1e-4)

    print("KERNEL_OK")
</pallas_src>

<mosaic_0001>
module attributes {stable_mosaic.version = 11 : i64} {
  func.func @_sine_encoder_kernel(%arg0: i32, %arg1: memref<16x1xf32, #tpu.memory_space<vmem>>, %arg2: memref<1x32xf32, #tpu.memory_space<vmem>>, %arg3: memref<1x32xf32, #tpu.memory_space<vmem>>, %arg4: memref<32x32xf32, #tpu.memory_space<vmem>>, %arg5: memref<1x32xf32, #tpu.memory_space<vmem>>, %arg6: memref<16x32xf32, #tpu.memory_space<vmem>>) attributes {dimension_semantics = [#tpu.dimension_semantics<parallel>], iteration_bounds = array<i64: 1>, scalar_prefetch = 0 : i64, scratch_operands = 0 : i64, tpu.core_type = #tpu.core_type<tc>, window_params = [{transform_indices = @transform_0, window_bounds = array<i64: 16, 1>}, {pipeline_mode = #tpu.pipeline_mode<synchronous>, transform_indices = @transform_1, window_bounds = array<i64: 1, 32>}, {pipeline_mode = #tpu.pipeline_mode<synchronous>, transform_indices = @transform_2, window_bounds = array<i64: 1, 32>}, {pipeline_mode = #tpu.pipeline_mode<synchronous>, transform_indices = @transform_3, window_bounds = array<i64: 32, 32>}, {pipeline_mode = #tpu.pipeline_mode<synchronous>, transform_indices = @transform_4, window_bounds = array<i64: 1, 32>}, {transform_indices = @transform_5, window_bounds = array<i64: 16, 32>}]} {
    %c0 = arith.constant 0 : index
    %c0_0 = arith.constant 0 : index
    %0 = vector.load %arg1[%c0, %c0_0] : memref<16x1xf32, #tpu.memory_space<vmem>>, vector<16x1xf32>
    %c0_1 = arith.constant 0 : index
    %c0_2 = arith.constant 0 : index
    %1 = vector.load %arg2[%c0_1, %c0_2] : memref<1x32xf32, #tpu.memory_space<vmem>>, vector<1x32xf32>
    %2 = vector.broadcast %0 : vector<16x1xf32> to vector<16x32xf32>
    %3 = vector.broadcast %1 : vector<1x32xf32> to vector<16x32xf32>
    %4 = arith.mulf %2, %3 : vector<16x32xf32>
    %5 = tpu.iota {dimensions = array<i32: 1>} : vector<16x32xi32>
    %c16_i32 = arith.constant 16 : i32
    %6 = vector.broadcast %c16_i32 : i32 to vector<16x32xi32>
    %7 = arith.cmpi slt, %5, %6 : vector<16x32xi32>
    %8 = math.sin %4 : vector<16x32xf32>
    %9 = math.cos %4 : vector<16x32xf32>
    %10 = arith.select %7, %8, %9 : vector<16x32xi1>, vector<16x32xf32>
    %c0_3 = arith.constant 0 : index
    %c0_4 = arith.constant 0 : index
    %11 = vector.load %arg4[%c0_3, %c0_4] : memref<32x32xf32, #tpu.memory_space<vmem>>, vector<32x32xf32>
    %cst = arith.constant dense<0.000000e+00> : vector<16x32xf32>
    %12 = tpu.matmul %10, %11, %cst {dimension_numbers = #tpu.dot_dimension_numbers<[1], [0], [0], [1], [0, 0, 1, 1], [], []>} : vector<16x32xf32>, vector<32x32xf32>, vector<16x32xf32> -> vector<16x32xf32>
    %c0_5 = arith.constant 0 : index
    %c0_6 = arith.constant 0 : index
    %13 = vector.load %arg3[%c0_5, %c0_6] : memref<1x32xf32, #tpu.memory_space<vmem>>, vector<1x32xf32>
    %14 = vector.broadcast %0 : vector<16x1xf32> to vector<16x32xf32>
    %15 = vector.broadcast %13 : vector<1x32xf32> to vector<16x32xf32>
    %16 = arith.mulf %14, %15 : vector<16x32xf32>
    %17 = arith.addf %12, %16 : vector<16x32xf32>
    %c0_7 = arith.constant 0 : index
    %c0_8 = arith.constant 0 : index
    %18 = vector.load %arg5[%c0_7, %c0_8] : memref<1x32xf32, #tpu.memory_space<vmem>>, vector<1x32xf32>
    %19 = vector.broadcast %18 : vector<1x32xf32> to vector<16x32xf32>
    %20 = arith.addf %17, %19 : vector<16x32xf32>
    %c0_9 = arith.constant 0 : index
    %c0_10 = arith.constant 0 : index
    %21 = vector.load %arg6[%c0_9, %c0_10] : memref<16x32xf32, #tpu.memory_space<vmem>>, vector<16x32xf32>
    tpu.vector_store %arg6[%c0_9, %c0_10], %20 {strides = array<i32>} : memref<16x32xf32, #tpu.memory_space<vmem>>, vector<16x32xf32>,
    return
  }
  func.func @transform_0(%arg0: i32) -> (i32, i32) {
    %c0_i32 = arith.constant 0 : i32
    %c0_i32_0 = arith.constant 0 : i32
    return %arg0, %c0_i32 : i32, i32
  }
  func.func @transform_1(%arg0: i32) -> (i32, i32) {
    %c0_i32 = arith.constant 0 : i32
    %c0_i32_0 = arith.constant 0 : i32
    %c0_i32_1 = arith.constant 0 : i32
    return %c0_i32, %c0_i32_0 : i32, i32
  }
  func.func @transform_2(%arg0: i32) -> (i32, i32) {
    %c0_i32 = arith.constant 0 : i32
    %c0_i32_0 = arith.constant 0 : i32
    %c0_i32_1 = arith.constant 0 : i32
    return %c0_i32, %c0_i32_0 : i32, i32
  }
  func.func @transform_3(%arg0: i32) -> (i32, i32) {
    %c0_i32 = arith.constant 0 : i32
    %c0_i32_0 = arith.constant 0 : i32
    %c0_i32_1 = arith.constant 0 : i32
    return %c0_i32, %c0_i32_0 : i32, i32
  }
  func.func @transform_4(%arg0: i32) -> (i32, i32) {
    %c0_i32 = arith.constant 0 : i32
    %c0_i32_0 = arith.constant 0 : i32
    %c0_i32_1 = arith.constant 0 : i32
    return %c0_i32, %c0_i32_0 : i32, i32
  }
  func.func @transform_5(%arg0: i32) -> (i32, i32) {
    %c0_i32 = arith.constant 0 : i32
    %c0_i32_0 = arith.constant 0 : i32
    return %arg0, %c0_i32 : i32, i32
  }
}

</mosaic_0001>

<bundles_post_ra>
// kernel: tpu_custom_call.1
= control target key start
LH: loop header
LB: loop body
LE: loop exit
PB: predicated region body
PF: predicated region fallthrough
CT: control target
= control target key end

     0   :  { %10 = vsyncpa [#allocation3], 0  ;;  %s1096_s0 = inlined_call_operand.hbm [shape: f32[16,1], index: 0, kind: input, shape index: {}]   ;;  %s1097_s1 = inlined_call_operand.hbm [shape: f32[1,32], index: 1, kind: input, shape index: {}]   ;;  %s1098_s2 = inlined_call_operand.hbm [shape: f32[1,32], index: 2, kind: input, shape index: {}]   ;;  %s1099_s3 = inlined_call_operand.hbm [shape: f32[32,32], index: 3, kind: input, shape index: {}]   ;;  %s1100_s4 = inlined_call_operand.hbm [shape: f32[1,32], index: 4, kind: input, shape index: {}]   ;;  %s1101_s5 = inlined_call_operand.hbm [shape: f32[16,32], index: 5, kind: output, shape index: {}]  }
   0x1   :  { %11 = vsyncpa [#allocation6], 0 }
   0x2   :  { %12 = vsyncpa [#allocation9], 0 }
   0x3   :  { %13 = vsyncpa [#allocation4], 0  ;;  %s866_s18 = smov [#allocation5]   ;;  %s726_s22 = scalar_lea.hbm %s1097_s1, 16 }
   0x4   :  { %s32_s19 = sshll.u32 %s866_s18, 4  ;;  %p727_p0 = scmp.ne.s32.totalorder %s1097_s1, %s726_s22  ;;  %s33_s19 = int_to_ptr.vmem [resolvable:$true] %s32_s19 }
   0x5   :  { %p730_p1 = scmp.lt.u32.totalorder %s726_s22, %s1097_s1 }
   0x7   :  { %p732_p2 = pnand %p730_p1, %p727_p0 }
   0x9   :  { %735 = shalt.err (!%p732_p2)
}
   0xa   :  { %s736_s27 = scalar_lea.vmem %s33_s19, 16  ;;  %s740_s28 = scalar_lea.vmem %s33_s19, 32 }
   0xb   :  { %p737_p3 = scmp.ne.s32.totalorder %s33_s19, %s736_s27  ;;  %p741_p4 = scmp.lt.s32.totalorder %s33_s19, %s33_s19 }
   0xc   :  { %p742_p5 = scmp.lt.s32.totalorder %s740_s28, %s736_s27 }
   0xe   :  { %p743_p6 = por %p742_p5, %p741_p4 }
  0x10   :  { %p744_p7 = pnand %p743_p6, %p737_p3 }
  0x12   :  { %747 = shalt.err (!%p744_p7)
}
  0x13   :  { %35 = dma.hbm_to_vmem [thread:$0]  %s1097_s1, 16, %s33_s19, [#allocation6]  }
  0x14   :  { %s867_s6 = smov [#allocation8]   ;;  %s868_s8 = smov [#allocation2]  }
  0x15   :  { %s51_s7 = sshll.u32 %s867_s6, 4  ;;  %s19_s9 = sshll.u32 %s868_s8, 4  ;;  %s52_s7 = int_to_ptr.vmem [resolvable:$true] %s51_s7  ;;  %s20_s9 = int_to_ptr.vmem [resolvable:$true] %s19_s9 }
  0x16   :  { %s748_s12 = scalar_lea.hbm %s1099_s3, 512 }
  0x17   :  { %p749_p8 = scmp.ne.s32.totalorder %s1099_s3, %s748_s12  ;;  %p752_p9 = scmp.lt.u32.totalorder %s748_s12, %s1099_s3 }
  0x19   :  { %p754_p10 = pnand %p752_p9, %p749_p8 }
  0x1b   :  { %757 = shalt.err (!%p754_p10)
}
  0x1c   :  { %s758_s1 = scalar_lea.vmem %s52_s7, 512  ;;  %p763_p12 = scmp.lt.s32.totalorder %s52_s7, %s52_s7 }
  0x1d   :  { %p759_p11 = scmp.ne.s32.totalorder %s52_s7, %s758_s1  ;;  %p764_p13 = scmp.lt.s32.totalorder %s758_s1, %s758_s1 }
  0x1f   :  { %p765_p0 = por %p764_p13, %p763_p12 }
  0x21   :  { %p766_p1 = pnand %p765_p0, %p759_p11 }
  0x23   :  { %769 = shalt.err (!%p766_p1)
}
  0x24   :  { %s869_s17 = smov 128   ;;  %s870_s18 = smov 8  }
  0x25   :  { %57 = dma.hbm_to_vmem [thread:$0]  %s1099_s3, 512, %s52_s7, [#allocation9], %s869_s17, %s869_s17, %s870_s18  }
  0x26   :  { %s770_s23 = scalar_lea.hbm %s1096_s0, 256 }
  0x27   :  { %p771_p2 = scmp.ne.s32.totalorder %s1096_s0, %s770_s23  ;;  %p774_p3 = scmp.lt.u32.totalorder %s770_s23, %s1096_s0 }
  0x29   :  { %p776_p4 = pnand %p774_p3, %p771_p2 }
  0x2b   :  { %779 = shalt.err (!%p776_p4)
}
  0x2c   :  { %s780_s28 = scalar_lea.vmem %s20_s9, 256  ;;  %p785_p6 = scmp.lt.s32.totalorder %s20_s9, %s20_s9 }
  0x2d   :  { %p781_p5 = scmp.ne.s32.totalorder %s20_s9, %s780_s28  ;;  %p786_p7 = scmp.lt.s32.totalorder %s780_s28, %s780_s28 }
  0x2f   :  { %p787_p8 = por %p786_p7, %p785_p6 }
  0x31   :  { %p788_p9 = pnand %p787_p8, %p781_p5 }
  0x33   :  { %791 = shalt.err (!%p788_p9)
}
  0x34   :  { %25 = dma.hbm_to_vmem [thread:$0]  %s1096_s0, 256, %s20_s9, [#allocation3], %s869_s17, %s869_s17, %s870_s18  }
  0x35   :  { %s871_s30 = smov [#allocation7]   ;;  %s872_s7 = smov [#allocation10]  }
  0x36   :  { %s42_s6 = sshll.u32 %s871_s30, 4  ;;  %s64_s8 = sshll.u32 %s872_s7, 4  ;;  %s43_s6 = int_to_ptr.vmem [resolvable:$true] %s42_s6  ;;  %s65_s8 = int_to_ptr.vmem [resolvable:$true] %s64_s8 }
  0x37   :  { %s792_s12 = scalar_lea.hbm %s1098_s2, 16 }
  0x38   :  { %p793_p10 = scmp.ne.s32.totalorder %s1098_s2, %s792_s12  ;;  %p796_p11 = scmp.lt.u32.totalorder %s792_s12, %s1098_s2 }
  0x3a   :  { %p798_p12 = pnand %p796_p11, %p793_p10 }
  0x3c   :  { %801 = shalt.err (!%p798_p12)
}
  0x3d   :  { %s802_s0 = scalar_lea.vmem %s43_s6, 16  ;;  %s806_s9 = scalar_lea.vmem %s43_s6, 32 }
  0x3e   :  { %p803_p13 = scmp.ne.s32.totalorder %s43_s6, %s802_s0  ;;  %p807_p0 = scmp.lt.s32.totalorder %s43_s6, %s43_s6 }
  0x3f   :  { %p808_p1 = scmp.lt.s32.totalorder %s806_s9, %s802_s0 }
  0x41   :  { %p809_p2 = por %p808_p1, %p807_p0 }
  0x43   :  { %p810_p3 = pnand %p809_p2, %p803_p13 }
  0x45   :  { %813 = shalt.err (!%p810_p3)
}
  0x46   :  { %45 = dma.hbm_to_vmem [thread:$0]  %s1098_s2, 16, %s43_s6, [#allocation6]  }
  0x47   :  { %s814_s22 = scalar_lea.hbm %s1100_s4, 16 }
  0x48   :  { %p815_p4 = scmp.ne.s32.totalorder %s1100_s4, %s814_s22  ;;  %p818_p5 = scmp.lt.u32.totalorder %s814_s22, %s1100_s4 }
  0x4a   :  { %p820_p6 = pnand %p818_p5, %p815_p4 }
  0x4c   :  { %823 = shalt.err (!%p820_p6)
}
  0x4d   :  { %s824_s27 = scalar_lea.vmem %s65_s8, 16  ;;  %s828_s28 = scalar_lea.vmem %s65_s8, 32 }
  0x4e   :  { %p825_p7 = scmp.ne.s32.totalorder %s65_s8, %s824_s27  ;;  %p829_p8 = scmp.lt.s32.totalorder %s65_s8, %s65_s8 }
  0x4f   :  { %p830_p9 = scmp.lt.s32.totalorder %s828_s28, %s824_s27 }
  0x51   :  { %p831_p10 = por %p830_p9, %p829_p8 }
  0x53   :  { %p832_p11 = pnand %p831_p10, %p825_p7 }
  0x55   :  { %835 = shalt.err (!%p832_p11)
}
  0x56   :  { %67 = dma.hbm_to_vmem [thread:$0]  %s1100_s4, 16, %s65_s8, [#allocation9]  }
  0x57   :  { %858 = dma.done.wait [#allocation3], 256  }
  0x58   :  { %859 = vsyncadd [#allocation3], 4294967040 }
  0x59   :  { %860 = dma.done.wait [#allocation6], 32  }
  0x5a   :  { %861 = vsyncadd [#allocation6], 4294967264 }
  0x5b   :  { %862 = dma.done.wait [#allocation9], 528  }
  0x5c   :  { %863 = vsyncadd [#allocation9], 4294966768  ;;  %v873_v0 = vmov 0   ;;  %v83_v1 = vld [vmem:[#allocation2] sm:$0xff]  ;;  %v84_v2 = vld [vmem:[#allocation2 + $0x8] sm:$0xff]  ;;  %s880_s4 = smov [#allocation11]  }
  0x5d   :  { %717 = vset.pattern.permute.xlu0 %v873_v0  ;;  %v523_v3 = vld [vmem:[#allocation8] sm:$0xff]  ;;  %v524_v4 = vld [vmem:[#allocation8 + $0x8] sm:$0xff]  ;;  %v525_v5 = vld [vmem:[#allocation8 + $0x10] sm:$0xff]  ;;  %v874_v32 = vmov 2102212464   ;;  %s634_s29 = sshll.u32 %s880_s4, 4  ;;  %s635_s29 = int_to_ptr.vmem [resolvable:$true] %s634_s29 }
  0x5e   :  { %88 = vperm.xlu0 %717, %v83_v1   ;;  %v686_v6 = vpack.c.bf16 %v524_v4, %v523_v3  ;;  %v526_v7 = vld [vmem:[#allocation8 + $0x18] sm:$0xff]  ;;  %v875_v34 = vmov 920167782   ;;  %v876_v38 = vmov 1326507024   ;;  %s836_s30 = scalar_lea.vmem %s635_s29, 256  ;;  %p841_p13 = scmp.lt.s32.totalorder %s635_s29, %s635_s29 }
  0x5f   :  { %v690_v8 = vpack.c.bf16 %v526_v7, %v525_v5  ;;  %v648_v9 = vld [vmem:[#allocation5] ss:$0 sm:$0xff]  ;;  %v877_v42 = vmov 683565275   ;;  %v878_v44 = vmov 2475754826   ;;  %p837_p12 = scmp.ne.s32.totalorder %s635_s29, %s836_s30  ;;  %p842_p0 = scmp.lt.s32.totalorder %s836_s30, %s836_s30 }
  0x60   :  { %687 = vmatprep.subr.bf16.mxu0 %v686_v6  ;;  %v879_v46 = vmov 2131351028  }
  0x61   :  { %689 = vmatpush3.bf16.msra.mxu0 %v686_v6  ;;  %p843_p1 = por %p842_p0, %p841_p13 }
  0x62   :  { %93 = vperm.xlu0 %717, %v84_v2   ;;  %691 = vmatprep.subr.bf16.mxu0 %v690_v8 }
  0x63   :  { %p844_p2 = pnand %p843_p1, %p837_p12 }
  0x65   :  { %693 = vmatpush3.bf16.msra.mxu0 %v690_v8 }
  0xdd   :  { %v977_v10 = vpop.permute.xlu0 %88 }
  0xde   :  { %v980_v11 = vmul.f32 %v648_v9, %v977_v10 }
  0xe0   :  { %v110_v12 = vand.u32 2139095040, %v980_v11  ;;  %v107_v19 = vand.u32 2147483647, %v980_v11 }
  0xe1   :  { %v983_v13 = vpop.permute.xlu0 %93 }
  0xe2   :  { %v111_v14 = vshrl.u32 %v110_v12, 23  ;;  %v986_v15 = vmul.f32 %v648_v9, %v983_v13  ;;  %v995_v24 = vand.u32 8388607, %v107_v19 }
  0xe4   :  { %v649_v16 = vadd.s32 4294967169, %v111_v14  ;;  %v211_v17 = vand.u32 2147483647, %v986_v15  ;;  %v214_v18 = vand.u32 2139095040, %v986_v15  ;;  %v115_v31 = vor.u32 8388608, %v995_v24 }
  0xe5   :  { %vm213_vm14 = vcmp.lt.s32.totalorder %v986_v15, 0 }
  0xe6   :  { %v117_v20 = vadd.s32 1, %v649_v16  ;;  %v215_v21 = vshrl.u32 %v214_v18, 23  ;;  %v218_v22 = vand.u32 8388607, %v211_v17  ;;  %vm212_vm15 = vcmp.le.f32.partialorder %v211_v17, 0.7853982 }
  0xe8   :  { %vm118_vm0 = vcmp.gt.s32.totalorder %v117_v20, 0  ;;  %v653_v23 = vadd.s32 4294967169, %v215_v21  ;;  %v219_v26 = vor.u32 8388608, %v218_v22 }
  0xe9   :  { %v119_v25 = vsel %vm118_vm0, %v117_v20, 0  ;;  %vm109_vm0 = vcmp.lt.s32.totalorder %v980_v11, 0 }
  0xea   :  { %v997_v27 = vshrl.u32 %v119_v25, 5  ;;  %v121_v28 = vand.u32 31, %v119_v25  ;;  %v221_v29 = vadd.s32 1, %v653_v23  ;;  %v1002_v36 = vshll.u32 %v219_v26, 8 }
  0xec   :  { %v999_v30 = vsub.s32 32, %v121_v28  ;;  %v133_v33 = vshll.u32 %v874_v32, %v121_v28  ;;  %v136_v35 = vshll.u32 %v875_v34, %v121_v28  ;;  %vm222_vm1 = vcmp.gt.s32.totalorder %v221_v29, 0 }
  0xed   :  { %vm142_vm2 = vcmp.lt.s32.totalorder %v997_v27, 4  ;;  %v223_v40 = vsel %vm222_vm1, %v221_v29, 0  ;;  %v124_v43 = vshll.u32 %v877_v42, %v121_v28  ;;  %v127_v45 = vshll.u32 %v878_v44, %v121_v28 }
  0xee   :  { %v134_v37 = vshrl.u32 %v875_v34, %v999_v30  ;;  %v137_v39 = vshrl.u32 %v876_v38, %v999_v30  ;;  %v225_v41 = vand.u32 31, %v223_v40  ;;  %v130_v47 = vshll.u32 %v879_v46, %v121_v28 }
  0xef   :  { %v224_v49 = vshrl.u32 %v223_v40, 5  ;;  %v125_v50 = vshrl.u32 %v878_v44, %v999_v30  ;;  %v128_v51 = vshrl.u32 %v879_v46, %v999_v30  ;;  %v131_v55 = vshrl.u32 %v874_v32, %v999_v30 }
  0xf0   :  { %v135_v48 = vor.u32 %v134_v37, %v133_v33  ;;  %v138_v52 = vor.u32 %v137_v39, %v136_v35  ;;  %v226_v53 = vsub.s32 32, %v225_v41  ;;  %v228_v54 = vshll.u32 %v877_v42, %v225_v41 }
  0xf1   :  { %v231_v57 = vshll.u32 %v878_v44, %v225_v41  ;;  %v234_v58 = vshll.u32 %v879_v46, %v225_v41  ;;  %v237_v59 = vshll.u32 %v874_v32, %v225_v41  ;;  %v240_v63 = vshll.u32 %v875_v34, %v225_v41 }
  0xf2   :  { %v148_v56 = vsel %vm142_vm2, %v135_v48, 920167782  ;;  %v229_v60 = vshrl.u32 %v878_v44, %v226_v53  ;;  %v232_v61 = vshrl.u32 %v879_v46, %v226_v53  ;;  %v235_v62 = vshrl.u32 %v874_v32, %v226_v53 }
  0xf3   :  { %vm139_vm3 = vcmp.lt.s32.totalorder %v997_v27, 1  ;;  %v227_v0 = vshrl.u32 %v877_v42, %v226_v53  ;;  %v238_v1 = vshrl.u32 %v875_v34, %v226_v53  ;;  %v241_v2 = vshrl.u32 %v876_v38, %v226_v53 }
  0xf4   :  { %vm243_vm4 = vcmp.lt.s32.totalorder %v224_v49, 1  ;;  %v230_v3 = vor.u32 %v229_v60, %v228_v54  ;;  %v233_v4 = vor.u32 %v232_v61, %v231_v57  ;;  %v236_v5 = vor.u32 %v235_v62, %v234_v58 }
  0xf5   :  { %vm245_vm5 = vcmp.lt.s32.totalorder %v224_v49, 3  ;;  %v239_v6 = vor.u32 %v238_v1, %v237_v59  ;;  %v242_v7 = vor.u32 %v241_v2, %v240_v63  ;;  %vm246_vm6 = vcmp.lt.s32.totalorder %v224_v49, 4 }
  0xf6   :  { %v126_v8 = vor.u32 %v125_v50, %v124_v43  ;;  %v247_v9 = vsel %vm243_vm4, %v227_v0, %v230_v3  ;;  %v248_v12 = vsel %vm246_vm6, %v236_v5, 2102212464  ;;  %v251_v14 = vsel %vm243_vm4, %v230_v3, %v233_v4 }
  0xf7   :  { %v255_v16 = vsel %vm243_vm4, %v233_v4, %v236_v5  ;;  %v249_v18 = vsel %vm245_vm5, %v233_v4, %v248_v12  ;;  %v252_v20 = vsel %vm246_vm6, %v239_v6, 920167782  ;;  %v256_v21 = vsel %vm246_vm6, %v242_v7, 1326507024 }
  0xf8   :  { %v129_v22 = vor.u32 %v128_v51, %v127_v45  ;;  %vm244_vm7 = vcmp.lt.s32.totalorder %v224_v49, 2  ;;  %v253_v23 = vsel %vm245_vm5, %v236_v5, %v252_v20  ;;  %v257_v25 = vsel %vm245_vm5, %v239_v6, %v256_v21 }
  0xf9   :  { %v132_v26 = vor.u32 %v131_v55, %v130_v47  ;;  %v152_v28 = vsel %vm142_vm2, %v138_v52, 1326507024  ;;  %v250_v29 = vsel %vm244_vm7, %v247_v9, %v249_v18  ;;  %v254_v32 = vsel %vm244_vm7, %v251_v14, %v253_v23 }
  0xfa   :  { %v258_v33 = vsel %vm244_vm7, %v255_v16, %v257_v25  ;;  %v1020_v37 = vmul.u32.u64.low %v1002_v36, %v254_v32  ;;  %v1021_v38 = vmul.u32.u64.high %v1002_v36, %v254_v32, %v1020_v37  ;;  %v123_v39 = vshrl.u32 %v877_v42, %v999_v30 }
  0xfb   :  { %v1016_v34 = vmul.u32.u64.low %v1002_v36, %v258_v33  ;;  %v1017_v35 = vmul.u32.u64.high %v1002_v36, %v258_v33, %v1016_v34  ;;  %vm141_vm8 = vcmp.lt.s32.totalorder %v997_v27, 3  ;;  %v144_v40 = vsel %vm142_vm2, %v132_v26, 2102212464 }
  0xfc   :  { %v147_v41 = vsel %vm139_vm3, %v126_v8, %v129_v22  ;;  %vm140_vm9 = vcmp.lt.s32.totalorder %v997_v27, 2  ;;  %v149_v43 = vsel %vm141_vm8, %v132_v26, %v148_v56  ;;  %v151_v44 = vsel %vm139_vm3, %v129_v22, %v132_v26 }
  0xfd   :  { %v153_v45 = vsel %vm141_vm8, %v135_v48, %v152_v28  ;;  %v266_v30 = vmul.u32 %v1002_v36, %v250_v29  ;;  %v150_v42 = vsel %vm140_vm9, %v147_v41, %v149_v43  ;;  %v155_v47 = vshll.u32 %v115_v31, 8 }
  0xfe   :  { %v154_v46 = vsel %vm140_vm9, %v151_v44, %v153_v45  ;;  %vm268_vm10 = vc.u32 %v1017_v35, %v1020_v37  ;;  %v269_v49 = vadd.s32 1, %v1021_v38  ;;  %v143_v50 = vsel %vm139_vm3, %v123_v39, %v126_v8 }
  0xff   :  { %v145_v48 = vsel %vm141_vm8, %v129_v22, %v144_v40  ;;  %v1049_v36 = vmul.u32.u64.low %v155_v47, %v154_v46  ;;  %v1050_v51 = vmul.u32.u64.high %v155_v47, %v154_v46, %v1049_v36  ;;  %v267_v12 = vadd.s32 %v1020_v37, %v1017_v35 }
 0x100   :  { %v1052_v52 = vmul.u32.u64.low %v155_v47, %v150_v42  ;;  %v1053_v53 = vmul.u32.u64.high %v155_v47, %v150_v42, %v1052_v52  ;;  %v270_v54 = vsel %vm268_vm10, %v269_v49, %v1021_v38  ;;  %v146_v31 = vsel %vm140_vm9, %v143_v50, %v145_v48 }
 0x101   :  { %v271_v24 = vadd.s32 %v270_v54, %v266_v30  ;;  %v162_v57 = vmul.u32 %v155_v47, %v146_v31  ;;  %vm108_vm1 = vcmp.le.f32.partialorder %v107_v19, 0.7853982  ;;  %vm303_vm10 = vweird.f32 %v986_v15 }
 0x102   :  { %vm164_vm11 = vc.u32 %v1050_v51, %v1052_v52  ;;  %v165_v56 = vadd.s32 1, %v1053_v53  ;;  %v163_v28 = vadd.s32 %v1052_v52, %v1050_v51 }
 0x103   :  { %v272_v55 = vadd.s32 536870912, %v271_v24 }
 0x104   :  { %v166_v59 = vsel %vm164_vm11, %v165_v56, %v1053_v53 }
 0x105   :  { %v273_v58 = vshrl.u32 %v272_v55, 30  ;;  %v167_v60 = vadd.s32 %v166_v59, %v162_v57  ;;  %v104_v55 = vlaneseq }
 0x107   :  { %v274_v61 = vshll.u32 %v273_v58, 30  ;;  %v168_v62 = vadd.s32 536870912, %v167_v60  ;;  %v297_v44 = vsub.s32 4, %v273_v58 }
 0x109   :  { %v275_v63 = vsub.s32 %v271_v24, %v274_v61  ;;  %v169_v0 = vshrl.u32 %v168_v62, 30  ;;  %v298_v49 = vsel %vm213_vm14, %v297_v44, %v273_v58  ;;  %v105_v61 = vand.u32 127, %v104_v55 }
 0x10a   :  { %v300_v52 = vsel %vm212_vm15, 0, %v298_v49 }
 0x10b   :  { %v277_v1 = vsub.s32 0, %v275_v63  ;;  %v170_v2 = vshll.u32 %v169_v0, 30  ;;  %v193_v36 = vsub.s32 4, %v169_v0  ;;  %v304_v17 = vadd.s32 3, %v300_v52 }
 0x10c   :  { %v511_v56 = vand.u32 3, %v300_v52  ;;  %vm106_vm8 = vcmp.lt.s32.totalorder %v105_v61, 16 }
 0x10d   :  { %v654_v3 = vmin.u32 %v277_v1, %v275_v63  ;;  %v171_v4 = vsub.s32 %v167_v60, %v170_v2  ;;  %v194_v54 = vsel %vm109_vm0, %v193_v36, %v169_v0  ;;  %v305_v57 = vand.u32 3, %v304_v17 }
 0x10e   :  { %v196_v31 = vsel %vm108_vm1, 0, %v194_v54  ;;  %vm513_vm2 = vcmp.eq.s32.totalorder %v511_v56, 0  ;;  %vm516_vm4 = vcmp.eq.s32.totalorder %v511_v56, 2  ;;  %vm512_vm7 = vcmp.lt.s32.totalorder %v511_v56, 2 }
 0x10f   :  { %v279_v27 = vclz %v654_v3  ;;  %v173_v5 = vsub.s32 0, %v171_v4  ;;  %v200_v58 = vadd.s32 3, %v196_v31  ;;  %vm310_vm3 = vcmp.eq.s32.totalorder %v305_v57, 2 }
 0x110   :  { %vm307_vm5 = vcmp.eq.s32.totalorder %v305_v57, 0  ;;  %vm306_vm6 = vcmp.lt.s32.totalorder %v305_v57, 2 }
 0x111   :  { %v655_v6 = vadd.s32 4294967294, %v279_v27  ;;  %v650_v7 = vmin.u32 %v173_v5, %v171_v4  ;;  %v201_v19 = vand.u32 3, %v200_v58 }
 0x113   :  { %vm656_vm12 = vcmp.lt.s32.totalorder %v655_v6, 0  ;;  %v175_v9 = vclz %v650_v7  ;;  %vm203_vm11 = vcmp.eq.s32.totalorder %v201_v19, 0 }
 0x114   :  { %v282_v8 = vsel %vm656_vm12, 0, %v655_v6  ;;  %vm206_vm12 = vcmp.eq.s32.totalorder %v201_v19, 2 }
 0x115   :  { %v283_v14 = vsub.s32 32, %v282_v8  ;;  %v287_v16 = vsub.s32 4294967266, %v282_v8  ;;  %v651_v18 = vadd.s32 4294967294, %v175_v9  ;;  %v284_v20 = vshll.u32 %v275_v63, %v282_v8 }
 0x116   :  { %v408_v63 = vand.u32 3, %v196_v31 }
 0x117   :  { %v285_v21 = vshrl.u32 %v267_v12, %v283_v14  ;;  %v288_v22 = vadd.s32 127, %v287_v16  ;;  %vm652_vm13 = vcmp.lt.s32.totalorder %v651_v18, 0 }
 0x118   :  { %v178_v26 = vsel %vm652_vm13, 0, %v651_v18  ;;  %vm410_vm9 = vcmp.eq.s32.totalorder %v408_v63, 0  ;;  %vm413_vm13 = vcmp.eq.s32.totalorder %v408_v63, 2 }
 0x119   :  { %v286_v23 = vor.u32 %v285_v21, %v284_v20  ;;  %v289_v25 = vshll.u32 %v288_v22, 23  ;;  %v179_v29 = vsub.s32 32, %v178_v26  ;;  %v183_v32 = vsub.s32 4294967266, %v178_v26 }
 0x11a   :  { %v180_v34 = vshll.u32 %v171_v4, %v178_v26 }
 0x11b   :  { %v290_v33 = vor.u32 4788187, %v289_v25  ;;  %v181_v38 = vshrl.u32 %v163_v28, %v179_v29  ;;  %v184_v39 = vadd.s32 127, %v183_v32  ;;  %v293_v35 = vcvt.s32.f32 %v286_v23  ;;  %v665_v29 = vld [vmem:[#allocation7] ss:$0 sm:$0xff] }
 0x11c   :  { %v535_v32 = vmul.f32 %v665_v29, %v983_v13 }
 0x11d   :  { %v291_v40 = vand.u32 2147483647, %v290_v33  ;;  %v182_v37 = vor.u32 %v181_v38, %v180_v34  ;;  %v185_v41 = vshll.u32 %v184_v39, 23  ;;  %v668_v34 = vld [vmem:[#allocation10] ss:$0 sm:$0xff] }
 0x11f   :  { %v294_v43 = vmul.f32 %v293_v35, %v291_v40  ;;  %v186_v45 = vor.u32 4788187, %v185_v41  ;;  %v189_v46 = vcvt.s32.f32 %v182_v37 }
 0x121   :  { %v295_v30 = vxor.u32 2147483648, %v294_v43  ;;  %v187_v42 = vand.u32 2147483647, %v186_v45 }
 0x123   :  { %v296_v47 = vsel %vm213_vm14, %v295_v30, %v294_v43  ;;  %v190_v48 = vmul.f32 %v189_v46, %v187_v42  ;;  %vm202_vm14 = vcmp.lt.s32.totalorder %v201_v19, 2 }
 0x124   :  { %v299_v50 = vsel %vm212_vm15, %v986_v15, %v296_v47  ;;  %vm409_vm15 = vcmp.lt.s32.totalorder %v408_v63, 2 }
 0x125   :  { %718 = vcosq.f32 %v299_v50  ;;  %v191_v51 = vxor.u32 2147483648, %v190_v48 }
 0x126   :  { %720 = vsinq.f32 %v299_v50 }
 0x127   :  { %v192_v53 = vsel %vm109_vm0, %v191_v51, %v190_v48  ;;  %vm199_vm0 = vweird.f32 %v980_v11 }
 0x128   :  { %v195_v24 = vsel %vm108_vm1, %v980_v11, %v192_v53  ;;  %vm536_vm1 = vcmask 261120   ;;  %v534_v11 = vmul.f32 %v665_v29, %v977_v10 }
 0x129   :  { %722 = vcosq.f32 %v195_v24 }
 0x12a   :  { %724 = vsinq.f32 %v195_v24 }
 0x12f   :  { %v719_v59 = vpop.eup %718 }
 0x130   :  { %v721_v60 = vpop.eup %720  ;;  %v311_v62 = vxor.u32 2147483648, %v719_v59 }
 0x131   :  { %v308_v1 = vxor.u32 2147483648, %v721_v60 }
 0x132   :  { %v312_v0 = vsel %vm310_vm3, %v311_v62, %v721_v60  ;;  %v518_v2 = vsel %vm516_vm4, %v311_v62, %v721_v60 }
 0x133   :  { %v309_v3 = vsel %vm307_vm5, %v719_v59, %v308_v1  ;;  %v515_v4 = vsel %vm513_vm2, %v719_v59, %v308_v1  ;;  %v723_v27 = vpop.eup %722 }
 0x134   :  { %v313_v5 = vsel %vm306_vm6, %v309_v3, %v312_v0  ;;  %v519_v6 = vsel %vm512_vm7, %v515_v4, %v518_v2  ;;  %v725_v7 = vpop.eup %724  ;;  %v207_v8 = vxor.u32 2147483648, %v723_v27 }
 0x135   :  { %v204_v9 = vxor.u32 2147483648, %v725_v7  ;;  %v314_v16 = vsel %vm303_vm10, nan, %v313_v5  ;;  %v520_v18 = vsel %vm303_vm10, nan, %v519_v6 }
 0x136   :  { %v208_v12 = vsel %vm206_vm12, %v207_v8, %v725_v7  ;;  %v415_v14 = vsel %vm413_vm13, %v207_v8, %v725_v7  ;;  %v522_v15 = vsel %vm106_vm8, %v314_v16, %v520_v18 }
 0x137   :  { %v205_v20 = vsel %vm203_vm11, %v723_v27, %v204_v9  ;;  %v412_v21 = vsel %vm410_vm9, %v723_v27, %v204_v9 }
 0x138   :  { %v209_v22 = vsel %vm202_vm14, %v205_v20, %v208_v12  ;;  %v416_v23 = vsel %vm409_vm15, %v412_v21, %v415_v14 }
 0x139   :  { %v210_v25 = vsel %vm199_vm0, nan, %v209_v22  ;;  %v417_v26 = vsel %vm199_vm0, nan, %v416_v23 }
 0x13a   :  { %v521_v28 = vsel %vm106_vm8, %v210_v25, %v417_v26 }
 0x13b   :  { %683 = vmatprep.mubr.msk.f32.mxu0 %vm536_vm1, %v521_v28 }
 0x13c   :  { %684 = vmatmul.mubr.msk.f32.vlgmr.msra.gmra.mrb[0].mxu0 %vm536_vm1, %v522_v15 }
 0x20f   :  { %v685_v33 = vpop.f32.mrb[0].mxu0 }
 0x210   :  { %v615_v38 = vadd.f32 %v685_v33, %v535_v32  ;;  %v609_v39 = vpop.f32.mrb[1].mxu0 }
 0x211   :  { %v610_v40 = vadd.f32 %v609_v39, %v534_v11 }
 0x212   :  { %v626_v35 = vadd.f32 %v668_v34, %v615_v38 }
 0x213   :  { %v625_v37 = vadd.f32 %v668_v34, %v610_v40 }
 0x214   :  { %628 = vst.msk [vmem:[#allocation11 + $0x8] sm:$0xff] %vm536_vm1, %v626_v35 }
 0x215   :  { %627 = vst.msk [vmem:[#allocation11] sm:$0xff] %vm536_vm1, %v625_v37 }
 0x216   :  { %847 = shalt.err (!%p844_p2)
}
 0x217   :  { %s848_s8 = scalar_lea.hbm %s1101_s5, 256 }
 0x218   :  { %p849_p3 = scmp.ne.s32.totalorder %s1101_s5, %s848_s8  ;;  %p852_p4 = scmp.lt.u32.totalorder %s848_s8, %s1101_s5 }
 0x21a   :  { %p854_p5 = pnand %p852_p4, %p849_p3 }
 0x21c   :  { %857 = shalt.err (!%p854_p5)
}
 0x21d   :  { %640 = dma.vmem_to_hbm [thread:$0]  %s635_s29, 256, %s1101_s5, [#allocation4], %s869_s17, %s869_s17, %s870_s18  }
 0x21e   :  { %864 = dma.done.wait [#allocation4], 256  }
 0x21f   :  { %865 = vsyncadd [#allocation4], 4294967040 }
 0x220   :  { %644 = vsyncpa [#allocation3], 1 }
 0x221   :  { %645 = vsyncpa [#allocation6], 1 }
 0x222   :  { %646 = vsyncpa [#allocation9], 1 }
 0x223   :  { %647 = vsyncpa [#allocation4], 1 }

</bundles_post_ra>
